<compile_context>
chip_gen: v7x
topology: tpu7x:2x2x1
jax: 0.10.0
libtpu: 0.0.40
codegen_flags: <defaults>
</compile_context>

<pallas_src>
import jax
import jax.numpy as jnp
from jax.experimental import pallas as pl
from jax.experimental.pallas import tpu as pltpu

# ----------------------- model hyper-params (synthetic) ----------------------
MOTOR_DIM = 4          # args.motor_dim
HDIM = (16, 16)        # args.hdim
MOTOR_EMBED_DIM = 32   # args.motor_embed_dim
# full layer widths: 4 -> 16 -> 16 -> 32
LAYER_DIMS = (MOTOR_DIM,) + HDIM + (MOTOR_EMBED_DIM,)


def act_embed_kernel(x_ref, w0_ref, w1_ref, w2_ref, o_ref):
    """One lane-dense batch tile through the full bias-free ReLU MLP.

    x_ref : [d_in,  B_tile]  bf16   (batch on lanes)
    wL_ref: [out_L, in_L]    bf16   (pre-transposed weights)
    o_ref : [d_out, B_tile]  f32    (lane-dense, unmasked stores)
    """
    # Linear 0 + ReLU   (bf16 operands, f32 accumulation on the MXU)
    h = jnp.dot(w0_ref[...], x_ref[...], preferred_element_type=jnp.float32)
    h = jnp.maximum(h, 0.0)
    # Linear 1 + ReLU
    h = jnp.dot(w1_ref[...], h.astype(jnp.bfloat16),
                preferred_element_type=jnp.float32)
    h = jnp.maximum(h, 0.0)
    # Linear 2 + ReLU (get_linear_layer appends actv after every Linear)
    h = jnp.dot(w2_ref[...], h.astype(jnp.bfloat16),
                preferred_element_type=jnp.float32)
    h = jnp.maximum(h, 0.0)
    o_ref[...] = h.astype(o_ref.dtype)


def act_embed_forward(motor_control, weights, *, batch_tile=512):
    """motor_control: [B, motor_dim]; weights: list of [in, out] f32 arrays."""
    B, d_in = motor_control.shape
    w0, w1, w2 = weights
    assert d_in == w0.shape[0]
    d_out = w2.shape[1]

    # Lane-dense batch tile: multiple of 128, collapsed to a single tile when B
    # is small, capped at `batch_tile` for large B.
    tile = min(batch_tile, 128 * pl.cdiv(B, 128))
    tile = 128 * pl.cdiv(tile, 128)
    b_pad = tile * pl.cdiv(B, tile)

    # Transposed (batch-on-lanes) bf16 operands; zero-pad ragged batch.
    x_t = jnp.zeros((d_in, b_pad), jnp.bfloat16)
    x_t = x_t.at[:, :B].set(motor_control.astype(jnp.bfloat16).T)
    w0t = w0.T.astype(jnp.bfloat16)   # [hdim0, d_in]
    w1t = w1.T.astype(jnp.bfloat16)   # [hdim1, hdim0]
    w2t = w2.T.astype(jnp.bfloat16)   # [d_out, hdim1]

    grid = (b_pad // tile,)

    def x_map(i):
        return (0, i)

    def w_map(i):
        return (0, 0)  # same block every step -> stays resident in VMEM

    flops = 2 * b_pad * sum(int(w.shape[0]) * int(w.shape[1]) for w in weights)
    bytes_accessed = (b_pad * d_in * 2          # bf16 input
                      + b_pad * d_out * 4       # f32 output
                      + sum(2 * int(w.size) for w in weights))

    out_t = pl.pallas_call(
        act_embed_kernel,
        out_shape=jax.ShapeDtypeStruct((d_out, b_pad), jnp.float32),
        grid_spec=pl.GridSpec(
            grid=grid,
            in_specs=[
                pl.BlockSpec((d_in, tile), x_map),
                pl.BlockSpec(w0t.shape, w_map),
                pl.BlockSpec(w1t.shape, w_map),
                pl.BlockSpec(w2t.shape, w_map),
            ],
            out_specs=pl.BlockSpec((d_out, tile), x_map),
        ),
        compiler_params=pltpu.CompilerParams(
            dimension_semantics=("parallel",),   # multi-step grids shard over v7x TCs
        ),
        cost_estimate=pl.CostEstimate(
            flops=flops, transcendentals=0, bytes_accessed=bytes_accessed),
    )(x_t, w0t, w1t, w2t)

    # Back to batch-major, drop padding, restore requested dtype.
    return out_t.T[:B].astype(motor_control.dtype)


def init_weights(key):
    """Deterministic Kaiming-uniform-ish init, stored as [in, out] (W^T of nn.Linear)."""
    ws = []
    for li in range(len(LAYER_DIMS) - 1):
        fan_in, fan_out = LAYER_DIMS[li], LAYER_DIMS[li + 1]
        key, sub = jax.random.split(key)
        bound = (1.0 / fan_in) ** 0.5
        w = jax.random.uniform(
            sub, (fan_in, fan_out), minval=-bound, maxval=bound,
            dtype=jnp.float32)
        ws.append(w)
    return ws


def act_embed_ref(x, weights):
    """Pure-JAX reference mimicking the kernel's bf16-operand / f32-accum numerics."""
    h = x.astype(jnp.bfloat16).astype(jnp.float32)
    for li, w in enumerate(weights):
        w32 = w.astype(jnp.bfloat16).astype(jnp.float32)
        h = jnp.maximum(h @ w32, 0.0)
        if li != len(weights) - 1:
            h = h.astype(jnp.bfloat16).astype(jnp.float32)
    return h


def act_embed_ref_f32(x, weights):
    """Full-precision reference (module semantics), for a loose sanity check."""
    h = x
    for w in weights:
        h = jnp.maximum(h @ w, 0.0)
    return h


if __name__ == "__main__":
    key = jax.random.PRNGKey(0)
    k_w, k_x = jax.random.split(key)

    weights = init_weights(k_w)
    batch = 16   # small, ragged-friendly: wrapper pads to one 128-lane tile
    motor_control = jax.random.normal(
        k_x, (batch, MOTOR_DIM), dtype=jnp.float32)

    out = act_embed_forward(motor_control, weights)
    out = jax.block_until_ready(out)

    assert out.shape == (batch, MOTOR_EMBED_DIM)
    # Tight check vs a reference with identical bf16/f32 numerics.
    ref = act_embed_ref(motor_control, weights)
    assert jnp.allclose(out, ref, atol=1e-3, rtol=1e-3), "mismatch vs bf16 reference"
    # Loose check vs the exact f32 module semantics (bf16 input rounding only).
    ref_f32 = act_embed_ref_f32(motor_control, weights)
    assert jnp.allclose(out, ref_f32, atol=5e-2, rtol=5e-2), "mismatch vs f32 reference"

    print("KERNEL_OK")
</pallas_src>

<mosaic_0001>
module attributes {stable_mosaic.version = 11 : i64} {
  func.func @act_embed_kernel(%arg0: i32, %arg1: memref<4x128xbf16, #tpu.memory_space<vmem>>, %arg2: memref<16x4xbf16, #tpu.memory_space<vmem>>, %arg3: memref<16x16xbf16, #tpu.memory_space<vmem>>, %arg4: memref<32x16xbf16, #tpu.memory_space<vmem>>, %arg5: memref<32x128xf32, #tpu.memory_space<vmem>>) attributes {dimension_semantics = [#tpu.dimension_semantics<parallel>], iteration_bounds = array<i64: 1>, scalar_prefetch = 0 : i64, scratch_operands = 0 : i64, tpu.core_type = #tpu.core_type<tc>, window_params = [{transform_indices = @transform_0, window_bounds = array<i64: 4, 128>}, {pipeline_mode = #tpu.pipeline_mode<synchronous>, transform_indices = @transform_1, window_bounds = array<i64: 16, 4>}, {pipeline_mode = #tpu.pipeline_mode<synchronous>, transform_indices = @transform_2, window_bounds = array<i64: 16, 16>}, {pipeline_mode = #tpu.pipeline_mode<synchronous>, transform_indices = @transform_3, window_bounds = array<i64: 32, 16>}, {transform_indices = @transform_4, window_bounds = array<i64: 32, 128>}]} {
    %c0 = arith.constant 0 : index
    %c0_0 = arith.constant 0 : index
    %0 = vector.load %arg2[%c0, %c0_0] : memref<16x4xbf16, #tpu.memory_space<vmem>>, vector<16x4xbf16>
    %c0_1 = arith.constant 0 : index
    %c0_2 = arith.constant 0 : index
    %1 = vector.load %arg1[%c0_1, %c0_2] : memref<4x128xbf16, #tpu.memory_space<vmem>>, vector<4x128xbf16>
    %cst = arith.constant dense<0.000000e+00> : vector<16x128xf32>
    %2 = tpu.matmul %0, %1, %cst {dimension_numbers = #tpu.dot_dimension_numbers<[1], [0], [0], [1], [0, 0, 1, 1], [], []>} : vector<16x4xbf16>, vector<4x128xbf16>, vector<16x128xf32> -> vector<16x128xf32>
    %cst_3 = arith.constant 0.000000e+00 : f32
    %3 = vector.broadcast %cst_3 : f32 to vector<16x128xf32>
    %4 = arith.maximumf %2, %3 : vector<16x128xf32>
    %c0_4 = arith.constant 0 : index
    %c0_5 = arith.constant 0 : index
    %5 = vector.load %arg3[%c0_4, %c0_5] : memref<16x16xbf16, #tpu.memory_space<vmem>>, vector<16x16xbf16>
    %6 = arith.truncf %4 : vector<16x128xf32> to vector<16x128xbf16>
    %cst_6 = arith.constant dense<0.000000e+00> : vector<16x128xf32>
    %7 = tpu.matmul %5, %6, %cst_6 {dimension_numbers = #tpu.dot_dimension_numbers<[1], [0], [0], [1], [0, 0, 1, 1], [], []>} : vector<16x16xbf16>, vector<16x128xbf16>, vector<16x128xf32> -> vector<16x128xf32>
    %cst_7 = arith.constant 0.000000e+00 : f32
    %8 = vector.broadcast %cst_7 : f32 to vector<16x128xf32>
    %9 = arith.maximumf %7, %8 : vector<16x128xf32>
    %c0_8 = arith.constant 0 : index
    %c0_9 = arith.constant 0 : index
    %10 = vector.load %arg4[%c0_8, %c0_9] : memref<32x16xbf16, #tpu.memory_space<vmem>>, vector<32x16xbf16>
    %11 = arith.truncf %9 : vector<16x128xf32> to vector<16x128xbf16>
    %cst_10 = arith.constant dense<0.000000e+00> : vector<32x128xf32>
    %12 = tpu.matmul %10, %11, %cst_10 {dimension_numbers = #tpu.dot_dimension_numbers<[1], [0], [0], [1], [0, 0, 1, 1], [], []>} : vector<32x16xbf16>, vector<16x128xbf16>, vector<32x128xf32> -> vector<32x128xf32>
    %cst_11 = arith.constant 0.000000e+00 : f32
    %13 = vector.broadcast %cst_11 : f32 to vector<32x128xf32>
    %14 = arith.maximumf %12, %13 : vector<32x128xf32>
    %c0_12 = arith.constant 0 : index
    %c0_13 = arith.constant 0 : index
    %15 = vector.load %arg5[%c0_12, %c0_13] : memref<32x128xf32, #tpu.memory_space<vmem>>, vector<32x128xf32>
    tpu.vector_store %arg5[%c0_12, %c0_13], %14 {strides = array<i32>} : memref<32x128xf32, #tpu.memory_space<vmem>>, vector<32x128xf32>,
    return
  }
  func.func @transform_0(%arg0: i32) -> (i32, i32) {
    %c0_i32 = arith.constant 0 : i32
    %c0_i32_0 = arith.constant 0 : i32
    return %c0_i32, %arg0 : i32, i32
  }
  func.func @transform_1(%arg0: i32) -> (i32, i32) {
    %c0_i32 = arith.constant 0 : i32
    %c0_i32_0 = arith.constant 0 : i32
    %c0_i32_1 = arith.constant 0 : i32
    return %c0_i32, %c0_i32_0 : i32, i32
  }
  func.func @transform_2(%arg0: i32) -> (i32, i32) {
    %c0_i32 = arith.constant 0 : i32
    %c0_i32_0 = arith.constant 0 : i32
    %c0_i32_1 = arith.constant 0 : i32
    return %c0_i32, %c0_i32_0 : i32, i32
  }
  func.func @transform_3(%arg0: i32) -> (i32, i32) {
    %c0_i32 = arith.constant 0 : i32
    %c0_i32_0 = arith.constant 0 : i32
    %c0_i32_1 = arith.constant 0 : i32
    return %c0_i32, %c0_i32_0 : i32, i32
  }
  func.func @transform_4(%arg0: i32) -> (i32, i32) {
    %c0_i32 = arith.constant 0 : i32
    %c0_i32_0 = arith.constant 0 : i32
    return %c0_i32, %arg0 : i32, i32
  }
}

</mosaic_0001>

<bundles_post_ra>
// kernel: tpu_custom_call.1
= control target key start
LH: loop header
LB: loop body
LE: loop exit
PB: predicated region body
PF: predicated region fallthrough
CT: control target
= control target key end

     0   :  { %vm31_vm0 = vcmask 1041408   ;;  %v293_v2 = vmov 0.0   ;;  %vm294_vm1 = vmmov 0   ;;  %vm27_vm2 = vcmask 31744   ;;  %s350_s0 = inlined_call_operand.vmem [shape: bf16[4,128], index: 0, kind: input, shape index: {}]   ;;  %s351_s1 = inlined_call_operand.vmem [shape: bf16[16,4], index: 1, kind: input, shape index: {}]   ;;  %s352_s2 = inlined_call_operand.vmem [shape: bf16[16,16], index: 2, kind: input, shape index: {}]   ;;  %s353_s3 = inlined_call_operand.vmem [shape: bf16[32,16], index: 3, kind: input, shape index: {}]   ;;  %s354_s4 = inlined_call_operand.hbm [shape: f32[32,128], index: 4, kind: output, shape index: {}]  }
   0x1   :  { %v21_v0 = vld [vmem:[%s350_s0] sm:$0x3]  ;;  %242 = vmatprep.subr.bf16.mxu0 %v293_v2  ;;  %244 = vmatprep.mubr.msk.bf16.mxu0 %vm294_vm1, %v293_v2 }
   0x2   :  { %v265_v1 = vld [vmem:[%s351_s1] sm:$0xff]   ;;  %v33_v3 = vsel %vm31_vm0, %v21_v0, 0  ;;  %248 = vmatprep.subr.bf16.mxu1 %v293_v2  ;;  %250 = vmatprep.mubr.msk.bf16.mxu1 %vm294_vm1, %v293_v2 }
   0x3   :  { %243 = vmatpush3.bf16.msra.mxu0 %v33_v3 }
   0x4   :  { %9 = vsyncpa [#allocation3], 0  ;;  %v266_v11 = vld [vmem:[%s352_s2] sm:$0xff]   ;;  %vm86_vm3 = vcmask 130048   ;;  %v268_v20 = vld [vmem:[%s353_s3 + $0x8] sm:$0xff]   ;;  %s295_s2 = smov [#allocation2]  }
   0x5   :  { %v267_v12 = vld [vmem:[%s353_s3] sm:$0xff]   ;;  %s216_s23 = sshll.u32 %s295_s2, 4  ;;  %s217_s23 = int_to_ptr.vmem [resolvable:$true] %s216_s23 }
   0x6   :  { %245 = vmatmul.mubr.msk.bf16.vlgmr.msra.gmra.mrb[0].mxu0 %vm27_vm2, %v265_v1  ;;  %s269_s24 = scalar_lea.vmem %s217_s23, 512  ;;  %p274_p1 = scmp.lt.s32.totalorder %s217_s23, %s217_s23 }
   0x7   :  { %256 = vmatprep.mubr.msk.bf16.mxu0 %vm86_vm3, %v267_v12  ;;  %p270_p0 = scmp.ne.s32.totalorder %s217_s23, %s269_s24  ;;  %p275_p2 = scmp.lt.s32.totalorder %s269_s24, %s269_s24 }
   0x9   :  { %p276_p3 = por %p275_p2, %p274_p1 }
   0xb   :  { %p277_p4 = pnand %p276_p3, %p270_p0 }
  0xd9   :  { %v69_v4 = vpop.f32.mrb[0].mxu0 }
  0xda   :  { %v246_v5 = vpop.f32.mrb[1].mxu0  ;;  %v76_v7 = vmax.f32 %v69_v4, 0.0 }
  0xdb   :  { %v72_v6 = vpop.f32.mrb[2].mxu0 }
  0xdc   :  { %v77_v8 = vmax.f32 %v72_v6, 0.0  ;;  %v247_v9 = vpop.f32.mrb[3].mxu0 }
  0xde   :  { %v80_v10 = vpack.c.bf16 %v77_v8, %v76_v7 }
  0xe0   :  { %249 = vmatpush3.bf16.msra.mxu1 %v80_v10 }
  0xe3   :  { %251 = vmatmul.mubr.msk.bf16.vlgmr.msra.gmra.mrb[0].mxu1 %vm86_vm3, %v266_v11 }
 0x1b6   :  { %v124_v13 = vpop.f32.mrb[0].mxu1 }
 0x1b7   :  { %v252_v14 = vpop.f32.mrb[1].mxu1  ;;  %v131_v16 = vmax.f32 %v124_v13, 0.0 }
 0x1b8   :  { %v127_v15 = vpop.f32.mrb[2].mxu1 }
 0x1b9   :  { %v132_v17 = vmax.f32 %v127_v15, 0.0  ;;  %v253_v18 = vpop.f32.mrb[3].mxu1 }
 0x1bb   :  { %v137_v19 = vpack.c.bf16 %v132_v17, %v131_v16 }
 0x1bd   :  { %254 = vmatprep.subr.bf16.mxu0 %v137_v19 }
 0x1be   :  { %255 = vmatpush3.bf16.msra.mxu0 %v137_v19 }
 0x1c1   :  { %257 = vmatmul.mubr.msk.bf16.vlgmr.msra.gmra.mrb[4].mxu0 %vm86_vm3, %v268_v20 }
 0x294   :  { %v258_v21 = vpop.f32.mrb[4].mxu0 }
 0x295   :  { %v205_v22 = vmax.f32 %v258_v21, 0.0  ;;  %v188_v23 = vpop.f32.mrb[5].mxu0 }
 0x296   :  { %v203_v24 = vmax.f32 %v188_v23, 0.0  ;;  %v259_v25 = vpop.f32.mrb[6].mxu0 }
 0x297   :  { %209 = vst [vmem:[#allocation2 + $0x10] sm:$0xff] %v205_v22  ;;  %v206_v26 = vmax.f32 %v259_v25, 0.0  ;;  %v191_v27 = vpop.f32.mrb[7].mxu0 }
 0x298   :  { %207 = vst [vmem:[#allocation2] sm:$0xff] %v203_v24  ;;  %v204_v28 = vmax.f32 %v191_v27, 0.0 }
 0x299   :  { %210 = vst [vmem:[#allocation2 + $0x18] sm:$0xff] %v206_v26 }
 0x29a   :  { %208 = vst [vmem:[#allocation2 + $0x8] sm:$0xff] %v204_v28 }
 0x29b   :  { %280 = shalt.err (!%p277_p4)
}
 0x29c   :  { %s281_s26 = scalar_lea.hbm %s354_s4, 512 }
 0x29d   :  { %p282_p5 = scmp.ne.s32.totalorder %s354_s4, %s281_s26  ;;  %p285_p6 = scmp.lt.u32.totalorder %s281_s26, %s354_s4 }
 0x29f   :  { %p287_p7 = pnand %p285_p6, %p282_p5 }
 0x2a1   :  { %290 = shalt.err (!%p287_p7)
}
 0x2a2   :  { %s296_s5 = smov 128   ;;  %s297_s6 = smov 8  }
 0x2a3   :  { %222 = dma.vmem_to_hbm [thread:$0]  %s217_s23, 512, %s354_s4, [#allocation3], %s296_s5, %s296_s5, %s297_s6  }
 0x2a4   :  { %291 = dma.done.wait [#allocation3], 512  }
 0x2a5   :  { %292 = vsyncadd [#allocation3], 4294966784 }
 0x2a6   :  { %226 = vsyncpa [#allocation3], 1 }

</bundles_post_ra>
